<compile_context>
chip_gen: v5e
topology: v5e:2x2
jax: 0.10.0
libtpu: 0.0.40
codegen_flags: <defaults>
</compile_context>

<pallas_src>
import math

import jax
import jax.numpy as jnp
from jax.experimental import pallas as pl
from jax.experimental.pallas import tpu as pltpu


# ----------------------------------------------------------------------------
# Kernel body
# ----------------------------------------------------------------------------
def _llama_mlp_kernel(x_ref, w13_ref, w2_ref, o_ref, acc_ref):
    # x_ref   : (tm, H)      activation row tile (resident across the ff axis)
    # w13_ref : (H, 2*tf)    fused gate||up projection tile (one MXU pass)
    # w2_ref  : (tf, H)      down-projection row tile
    # o_ref   : (tm, H)      output tile (written on the last ff step)
    # acc_ref : (tm, H) f32  accumulator scratch
    f = pl.program_id(1)
    tf = w2_ref.shape[0]

    x = x_ref[...]
    # One MXU pass computes both projections (W1 and W3 fused on the lane axis).
    h = jnp.dot(x, w13_ref[...], preferred_element_type=jnp.float32)  # (tm, 2tf)
    h1 = h[:, :tf]
    h3 = h[:, tf:]

    # SiLU gate in f32; keep the divide on the EUP slot.
    sig = pl.reciprocal(1.0 + jnp.exp(-h1), approx=True)
    gated = h1 * sig * h3

    partial = jnp.dot(gated.astype(w2_ref.dtype), w2_ref[...],
                      preferred_element_type=jnp.float32)

    @pl.when(f == 0)
    def _():
        acc_ref[...] = partial          # first ff step: assign (no zero+reload)

    @pl.when(f != 0)
    def _():
        acc_ref[...] += partial

    @pl.when(f == pl.num_programs(1) - 1)
    def _():
        o_ref[...] = acc_ref[...].astype(o_ref.dtype)


# ----------------------------------------------------------------------------
# Tiling / chip heuristics
# ----------------------------------------------------------------------------
def _round_up(x, q):
    return (x + q - 1) // q * q


def _device_kind():
    try:
        return jax.devices()[0].device_kind.lower()
    except Exception:
        return ""


def _chip_defaults(kind):
    if "v7" in kind:
        # 64 MiB is the ENTIRE per-TC VMEM on v7x: leave headroom for Mosaic.
        return dict(tm=512, tf=256, vmem=56 << 20, mxu_rows=256)
    if "v6" in kind:
        # Crossover ~640 FLOP/byte -> need a tall row tile; physical VMEM 128 MiB.
        return dict(tm=768, tf=512, vmem=100 << 20, mxu_rows=256)
    if "v5e" in kind or "v5 lite" in kind or "v5lite" in kind:
        # Crossover ~240 FLOP/byte -> tm=256 is already compute-bound.
        return dict(tm=256, tf=512, vmem=64 << 20, mxu_rows=128)
    # Unknown chip (v4 / v5p / interpret): conservative middle ground.
    return dict(tm=512, tf=512, vmem=64 << 20, mxu_rows=128)


def _pick_row_tile(M, desired, sublane, mxu_rows):
    """Packed-sublane aligned, MXU-row aligned row tile with <~10% padding waste."""
    desired = max(sublane, desired)
    if M <= desired:
        return _round_up(M, sublane)          # single tile, minimal padding
    desired = max(mxu_rows, (desired // mxu_rows) * mxu_rows)
    best_tm, best_waste = desired, 1.0
    tm = desired
    while tm >= mxu_rows:
        m_pad = _round_up(M, tm)
        waste = (m_pad - M) / m_pad
        if waste <= 0.10:
            return tm
        if waste < best_waste:
            best_tm, best_waste = tm, waste
        tm -= mxu_rows
    return best_tm


def _vmem_estimate(tm, tf, H, act_isz, w_isz, out_isz):
    x_b = 2 * tm * H * act_isz            # double-buffered activation rows
    o_b = 2 * tm * H * out_isz            # double-buffered output rows
    acc_b = tm * H * 4                    # f32 accumulator scratch
    w13_b = 2 * H * (2 * tf) * w_isz      # double-buffered fused gate/up tile
    w2_b = 2 * tf * H * w_isz             # double-buffered down tile
    return x_b + o_b + acc_b + w13_b + w2_b


# ----------------------------------------------------------------------------
# One-time weight preparation (model init — NOT the per-call hot path)
# ----------------------------------------------------------------------------
def prepare_llama_mlp_weights(w1, w3, w2, *, tf=None, dtype=None):
    """Pre-tile PyTorch-layout weights into contiguous per-ff-tile blocks.

    Inputs (PyTorch Linear layout, (out_features, in_features)):
      w1, w3 : (F, H)   gate / up projections
      w2     : (H, F)   down projection
    Returns:
      w13_blocks : (F_pad//tf, H, 2*tf)  — W1^T || W3^T fused on the lane axis
      w2_blocks  : (F_pad//tf, tf, H)
    F is zero-padded to a multiple of tf: zero gate columns give silu(0)*0 = 0
    and zero W2 rows contribute nothing, so padding is exact (handles F=11008).
    """
    F_dim, H = w1.shape
    assert w3.shape == (F_dim, H) and w2.shape == (H, F_dim)
    if dtype is None:
        dtype = w1.dtype
    if tf is None:
        tf = _chip_defaults(_device_kind())["tf"]
    tf = max(128, min(_round_up(tf, 128), _round_up(F_dim, 128)))
    F_pad = _round_up(F_dim, tf)
    Fb = F_pad // tf

    w1_t = jnp.asarray(w1).T.astype(dtype)   # (H, F)
    w3_t = jnp.asarray(w3).T.astype(dtype)   # (H, F)
    w2_t = jnp.asarray(w2).T.astype(dtype)   # (F, H)
    if F_pad != F_dim:
        pad = F_pad - F_dim
        w1_t = jnp.pad(w1_t, ((0, 0), (0, pad)))
        w3_t = jnp.pad(w3_t, ((0, 0), (0, pad)))
        w2_t = jnp.pad(w2_t, ((0, pad), (0, 0)))

    w1_b = w1_t.reshape(H, Fb, tf).transpose(1, 0, 2)          # (Fb, H, tf)
    w3_b = w3_t.reshape(H, Fb, tf).transpose(1, 0, 2)          # (Fb, H, tf)
    w13_blocks = jnp.concatenate([w1_b, w3_b], axis=-1)        # (Fb, H, 2*tf)
    w2_blocks = w2_t.reshape(Fb, tf, H)                        # (Fb, tf, H)
    return w13_blocks, w2_blocks


# ----------------------------------------------------------------------------
# Forward wrapper
# ----------------------------------------------------------------------------
def llama_parallel_mlp(hidden_states, w13_blocks, w2_blocks, *, tm=None,
                       vmem_limit_bytes=None):
    """Fused LLaMA SwiGLU MLP.

    hidden_states : [S, B, H]        Megatron [seq, batch, hidden] layout
    w13_blocks    : [Fb, H, 2*tf]    from prepare_llama_mlp_weights
    w2_blocks     : [Fb, tf, H]      from prepare_llama_mlp_weights
    """
    S, B, H = hidden_states.shape
    Fb, H_w, two_tf = w13_blocks.shape
    tf = two_tf // 2
    assert H_w == H and w2_blocks.shape == (Fb, tf, H)
    F_pad = Fb * tf

    kind = _device_kind()
    cfg = _chip_defaults(kind)
    if tm is None:
        tm = cfg["tm"]
    if vmem_limit_bytes is None:
        vmem_limit_bytes = cfg["vmem"]
    mxu_rows = cfg["mxu_rows"]

    compute_dtype = w13_blocks.dtype
    act_isz = jnp.dtype(compute_dtype).itemsize
    w_isz = jnp.dtype(w13_blocks.dtype).itemsize
    out_isz = jnp.dtype(hidden_states.dtype).itemsize

    M = S * B
    sublane = max(8, 32 // act_isz)          # 8 for f32, 16 for bf16, 32 for i8/fp8
    tm = _pick_row_tile(M, tm, sublane, mxu_rows)
    # Shrink tm if the double-buffered working set would exceed ~90% of budget.
    while (tm > sublane and
           _vmem_estimate(tm, tf, H, act_isz, w_isz, out_isz)
           > 0.9 * vmem_limit_bytes):
        tm = max(sublane, _round_up(tm // 2, sublane))

    M_pad = _round_up(M, tm)
    x2d = hidden_states.reshape(M, H).astype(compute_dtype)
    if M_pad != M:
        x2d = jnp.pad(x2d, ((0, M_pad - M), (0, 0)))

    grid = (M_pad // tm, Fb)
    n_row_tiles = M_pad // tm

    # Advisory cost: weights are re-streamed once per row tile; sigmoid is
    # exp + reciprocal per element.
    w_bytes = (w13_blocks.size + w2_blocks.size) * w_isz
    act_bytes = M_pad * H * (act_isz + out_isz)
    cost = pl.CostEstimate(
        flops=int(6 * M_pad * H * F_pad),
        transcendentals=int(2 * M_pad * F_pad),
        bytes_accessed=int(w_bytes * n_row_tiles + act_bytes),
    )

    out2d = pl.pallas_call(
        _llama_mlp_kernel,
        out_shape=jax.ShapeDtypeStruct((M_pad, H), hidden_states.dtype),
        grid_spec=pltpu.PrefetchScalarGridSpec(
            num_scalar_prefetch=0,
            grid=grid,
            in_specs=[
                pl.BlockSpec((tm, H), lambda i, f: (i, 0)),        # x rows
                pl.BlockSpec((None, H, 2 * tf), lambda i, f: (f, 0, 0)),  # W1||W3
                pl.BlockSpec((None, tf, H), lambda i, f: (f, 0, 0)),      # W2
            ],
            out_specs=pl.BlockSpec((tm, H), lambda i, f: (i, 0)),
            scratch_shapes=[pltpu.VMEM((tm, H), jnp.float32)],
        ),
        compiler_params=pltpu.CompilerParams(
            dimension_semantics=("parallel", "arbitrary"),
            vmem_limit_bytes=vmem_limit_bytes),
        cost_estimate=cost,
    )(x2d, w13_blocks, w2_blocks)

    if M_pad != M:
        out2d = out2d[:M]
    return out2d.reshape(S, B, H)


# ----------------------------------------------------------------------------
# Pure-JAX reference
# ----------------------------------------------------------------------------
def _reference(hidden_states, w1, w3, w2):
    x = hidden_states.astype(jnp.float32)
    h1 = x @ w1.T.astype(jnp.float32)
    h3 = x @ w3.T.astype(jnp.float32)
    g = jax.nn.silu(h1) * h3
    return g @ w2.T.astype(jnp.float32)


if __name__ == "__main__":
    # neox_args-equivalent small config (TPU-tileable)
    hidden_size = 32
    multiple_of = 256
    seq, batch = 8, 2

    # ff_dim exactly as the module computes it
    ff_dim = int(2 * hidden_size * 4 / 3)
    ff_dim = multiple_of * ((ff_dim + multiple_of - 1) // multiple_of)  # -> 256

    key = jax.random.PRNGKey(0)
    kx, k1, k3, k2 = jax.random.split(key, 4)

    # deterministic "init_method"-style weights, PyTorch (out, in) layout
    std = 0.02
    hidden_states = jax.random.normal(kx, (seq, batch, hidden_size), jnp.float32)
    w1 = std * jax.random.normal(k1, (ff_dim, hidden_size), jnp.float32)
    w3 = std * jax.random.normal(k3, (ff_dim, hidden_size), jnp.float32)
    w2 = (std / math.sqrt(2.0)) * jax.random.normal(
        k2, (hidden_size, ff_dim), jnp.float32)

    ref = _reference(hidden_states, w1, w3, w2)

    # --- f32 path (tight tolerance vs the all-f32 reference).  tf=128
    # exercises the ff-axis accumulation at this small size; real LLaMA shapes
    # use the per-chip tf default (256/512).
    w13_f32, w2b_f32 = prepare_llama_mlp_weights(w1, w3, w2, tf=128,
                                                 dtype=jnp.float32)
    out = llama_parallel_mlp(hidden_states, w13_f32, w2b_f32)
    out = jax.block_until_ready(out)
    assert out.shape == (seq, batch, hidden_size)
    assert jnp.allclose(out.astype(jnp.float32), ref, atol=1e-4, rtol=1e-4), \
        "f32 mismatch vs reference"

    # --- production-style bf16 path (mixed precision; f32 accumulation).
    w13_bf, w2b_bf = prepare_llama_mlp_weights(w1, w3, w2, tf=128,
                                               dtype=jnp.bfloat16)
    out_bf = llama_parallel_mlp(hidden_states.astype(jnp.bfloat16),
                                w13_bf, w2b_bf)
    out_bf = jax.block_until_ready(out_bf)
    assert jnp.allclose(out_bf.astype(jnp.float32), ref, atol=5e-3, rtol=5e-2), \
        "bf16 mismatch vs reference"

    print("KERNEL_OK")
</pallas_src>

<mosaic_0001>
module attributes {stable_mosaic.version = 11 : i64} {
  func.func @_llama_mlp_kernel(%arg0: i32, %arg1: i32, %arg2: memref<16x32xf32, #tpu.memory_space<vmem>>, %arg3: memref<1x32x256xf32, #tpu.memory_space<vmem>>, %arg4: memref<1x128x32xf32, #tpu.memory_space<vmem>>, %arg5: memref<16x32xf32, #tpu.memory_space<vmem>>, %arg6: memref<16x32xf32, #tpu.memory_space<vmem>>) attributes {dimension_semantics = [#tpu.dimension_semantics<parallel>, #tpu.dimension_semantics<arbitrary>], iteration_bounds = array<i64: 1, 2>, scalar_prefetch = 0 : i64, scratch_operands = 1 : i64, tpu.core_type = #tpu.core_type<tc>, window_params = [{transform_indices = @transform_0, window_bounds = array<i64: 16, 32>}, {transform_indices = @transform_1, window_bounds = array<i64: 1, 32, 256>}, {transform_indices = @transform_2, window_bounds = array<i64: 1, 128, 32>}, {transform_indices = @transform_3, window_bounds = array<i64: 16, 32>}]} {
    %c0 = arith.constant 0 : index
    %c0_0 = arith.constant 0 : index
    %0 = vector.load %arg2[%c0, %c0_0] : memref<16x32xf32, #tpu.memory_space<vmem>>, vector<16x32xf32>
    %c0_1 = arith.constant 0 : index
    %c0_2 = arith.constant 0 : index
    %c0_3 = arith.constant 0 : index
    %1 = vector.load %arg3[%c0_1, %c0_2, %c0_3] : memref<1x32x256xf32, #tpu.memory_space<vmem>>, vector<1x32x256xf32>
    %2 = vector.shape_cast %1 : vector<1x32x256xf32> to vector<32x256xf32>
    %cst = arith.constant dense<0.000000e+00> : vector<16x256xf32>
    %3 = tpu.matmul %0, %2, %cst {dimension_numbers = #tpu.dot_dimension_numbers<[1], [0], [0], [1], [0, 0, 1, 1], [], []>} : vector<16x32xf32>, vector<32x256xf32>, vector<16x256xf32> -> vector<16x256xf32>
    %4 = vector.extract_strided_slice %3 {offsets = [0, 0], sizes = [16, 128], strides = [1, 1]} : vector<16x256xf32> to vector<16x128xf32>
    %5 = vector.extract_strided_slice %3 {offsets = [0, 128], sizes = [16, 128], strides = [1, 1]} : vector<16x256xf32> to vector<16x128xf32>
    %cst_4 = arith.constant 0.000000e+00 : f32
    %6 = vector.broadcast %cst_4 : f32 to vector<16x128xf32>
    %7 = arith.subf %6, %4 : vector<16x128xf32>
    %8 = math.exp %7 : vector<16x128xf32>
    %cst_5 = arith.constant 1.000000e+00 : f32
    %9 = vector.broadcast %cst_5 : f32 to vector<16x128xf32>
    %10 = arith.addf %9, %8 : vector<16x128xf32>
    %11 = tpu.reciprocal %10 {approx = true} : vector<16x128xf32> -> vector<16x128xf32>
    %12 = arith.mulf %4, %11 : vector<16x128xf32>
    %13 = arith.mulf %12, %5 : vector<16x128xf32>
    %c0_6 = arith.constant 0 : index
    %c0_7 = arith.constant 0 : index
    %c0_8 = arith.constant 0 : index
    %14 = vector.load %arg4[%c0_6, %c0_7, %c0_8] : memref<1x128x32xf32, #tpu.memory_space<vmem>>, vector<1x128x32xf32>
    %15 = vector.shape_cast %14 : vector<1x128x32xf32> to vector<128x32xf32>
    %cst_9 = arith.constant dense<0.000000e+00> : vector<16x32xf32>
    %16 = tpu.matmul %13, %15, %cst_9 {dimension_numbers = #tpu.dot_dimension_numbers<[1], [0], [0], [1], [0, 0, 1, 1], [], []>} : vector<16x128xf32>, vector<128x32xf32>, vector<16x32xf32> -> vector<16x32xf32>
    %c0_i32 = arith.constant 0 : i32
    %17 = arith.cmpi eq, %arg1, %c0_i32 : i32
    %18 = arith.extui %17 : i1 to i32
    %c0_i32_10 = arith.constant 0 : i32
    %19 = arith.cmpi ne, %18, %c0_i32_10 : i32
    scf.if %19 {
      %c0_14 = arith.constant 0 : index
      %c0_15 = arith.constant 0 : index
      %26 = vector.load %arg6[%c0_14, %c0_15] : memref<16x32xf32, #tpu.memory_space<vmem>>, vector<16x32xf32>
      tpu.vector_store %arg6[%c0_14, %c0_15], %16 {strides = array<i32>} : memref<16x32xf32, #tpu.memory_space<vmem>>, vector<16x32xf32>,
    } else {
    }
    %c0_i32_11 = arith.constant 0 : i32
    %20 = arith.cmpi ne, %arg1, %c0_i32_11 : i32
    %21 = arith.extui %20 : i1 to i32
    %c0_i32_12 = arith.constant 0 : i32
    %22 = arith.cmpi ne, %21, %c0_i32_12 : i32
    scf.if %22 {
      %c0_14 = arith.constant 0 : index
      %c0_15 = arith.constant 0 : index
      %26 = vector.load %arg6[%c0_14, %c0_15] : memref<16x32xf32, #tpu.memory_space<vmem>>, vector<16x32xf32>
      %27 = arith.addf %26, %16 : vector<16x32xf32>
      %c0_16 = arith.constant 0 : index
      %c0_17 = arith.constant 0 : index
      %28 = vector.load %arg6[%c0_16, %c0_17] : memref<16x32xf32, #tpu.memory_space<vmem>>, vector<16x32xf32>
      tpu.vector_store %arg6[%c0_16, %c0_17], %27 {strides = array<i32>} : memref<16x32xf32, #tpu.memory_space<vmem>>, vector<16x32xf32>,
    } else {
    }
    %c1_i32 = arith.constant 1 : i32
    %23 = arith.cmpi eq, %arg1, %c1_i32 : i32
    %24 = arith.extui %23 : i1 to i32
    %c0_i32_13 = arith.constant 0 : i32
    %25 = arith.cmpi ne, %24, %c0_i32_13 : i32
    scf.if %25 {
      %c0_14 = arith.constant 0 : index
      %c0_15 = arith.constant 0 : index
      %26 = vector.load %arg6[%c0_14, %c0_15] : memref<16x32xf32, #tpu.memory_space<vmem>>, vector<16x32xf32>
      %c0_16 = arith.constant 0 : index
      %c0_17 = arith.constant 0 : index
      %27 = vector.load %arg5[%c0_16, %c0_17] : memref<16x32xf32, #tpu.memory_space<vmem>>, vector<16x32xf32>
      tpu.vector_store %arg5[%c0_16, %c0_17], %26 {strides = array<i32>} : memref<16x32xf32, #tpu.memory_space<vmem>>, vector<16x32xf32>,
    } else {
    }
    return
  }
  func.func @transform_0(%arg0: i32, %arg1: i32) -> (i32, i32) {
    %c0_i32 = arith.constant 0 : i32
    %c0_i32_0 = arith.constant 0 : i32
    return %arg0, %c0_i32 : i32, i32
  }
  func.func @transform_1(%arg0: i32, %arg1: i32) -> (i32, i32, i32) {
    %c0_i32 = arith.constant 0 : i32
    %c0_i32_0 = arith.constant 0 : i32
    %c0_i32_1 = arith.constant 0 : i32
    return %arg1, %c0_i32, %c0_i32_0 : i32, i32, i32
  }
  func.func @transform_2(%arg0: i32, %arg1: i32) -> (i32, i32, i32) {
    %c0_i32 = arith.constant 0 : i32
    %c0_i32_0 = arith.constant 0 : i32
    %c0_i32_1 = arith.constant 0 : i32
    return %arg1, %c0_i32, %c0_i32_0 : i32, i32, i32
  }
  func.func @transform_3(%arg0: i32, %arg1: i32) -> (i32, i32) {
    %c0_i32 = arith.constant 0 : i32
    %c0_i32_0 = arith.constant 0 : i32
    return %arg0, %c0_i32 : i32, i32
  }
}

</mosaic_0001>

<bundles_post_ra>
// kernel: tpu_custom_call.1
= control target key start
LH: loop header
LB: loop body
LE: loop exit
PB: predicated region body
PF: predicated region fallthrough
CT: control target
= control target key end

     0   :  { %8 = vsyncpa [#allocation4], 0  ;;  %s606_s12 = smov 0   ;;  %s608_s13 = smov 0   ;;  %s686_s0 = inlined_call_operand.vmem [shape: f32[16,32], index: 0, kind: input, shape index: {}]   ;;  %s687_s1 = inlined_call_operand.vmem [shape: f32[2,32,256], index: 1, kind: input, shape index: {}]   ;;  %s688_s2 = inlined_call_operand.vmem [shape: f32[2,128,32], index: 2, kind: input, shape index: {}]   ;;  %s689_s3 = inlined_call_operand.hbm [shape: f32[16,32], index: 3, kind: output, shape index: {}]  }
   0x1   :  { %s610_s14 = smov 0  }
   0x2 LB: > { %s448_s15 = sadd.s32 4294967295, %s581_s14   ;;  %s23_s16 = sadd.s32 1, %s577_s13  ;;  %s581_s14 = sphi %s610_s14, %s14_s14   ;;  %s577_s13 = sphi %s608_s13, %s691_s13   ;;  %s573_s12 = sphi %s606_s12, %s690_s12  }
   0x3   : > { %p24_p0 = scmp.ge.s32.totalorder %s23_s16, 2  ;;  %p452_p1 = scmp.ge.s32.totalorder %s581_s14, 1 }
   0x4   : > { %p171_p2 = scmp.lt.s32.totalorder %s581_s14, 3 }
   0x5   : > { %s693_s16 = smov (%p24_p0, %s23_s16), 0 }
   0x6   : > { %p172_p3 = pnand %p452_p1, %p171_p2 }
   0x7   : > { %p206_p4 = scmp.lt.s32.totalorder (!%p172_p3), %s573_s12, 1  ;;  %p461_p5 = scmp.ne.s32.totalorder (!%p172_p3), %s573_s12, 0 }
   0x8   : > { %175 = sbr.rel (%p172_p3) target bundleno = 345 (0x159), region = 32 }
   0xd   : > { %s207_s17 = scalar_select %p206_p4, %s573_s12, 1  ;;  %v217_v10 = vld [vmem:[%s686_s0] sm:$0xff]  ;;  %vm227_vm0 = vcmask 261120   ;;  %v218_v12 = vld [vmem:[%s686_s0 + $0x8] sm:$0xff] }
   0xf   : > { %s468_s18 = sshll.u32 %s207_s17, 6  ;;  %s469_s19 = sshll.u32 %s207_s17, 7 }
  0x10   : > { %s210_s22 = scalar_lea.vmem %s687_s1, %s468_s18  ;;  %s635_s25 = scalar_lea.vmem %s688_s2, %s469_s19 }
  0x11   : > { %v225_v0 = vld [vmem:[%s210_s22 + $0x30] sm:$0xff]  ;;  %v223_v1 = vld [vmem:[%s210_s22 + $0x20] sm:$0xff]  ;;  %v226_v2 = vld [vmem:[%s210_s22 + $0x38] sm:$0xff] }
  0x12   : > { %246 = vmatpush.msra.mxu0 %v225_v0  ;;  %v224_v3 = vld [vmem:[%s210_s22 + $0x28] sm:$0xff]  ;;  %v221_v4 = vld [vmem:[%s210_s22 + $0x10] sm:$0xff]  ;;  %269 = vmatpush.msra.mxu1 %v226_v2  ;;  %v309_v5 = vld [vmem:[%s635_s25 + $0x78] sm:$0xff] }
  0x13   : > { %v222_v6 = vld [vmem:[%s210_s22 + $0x18] sm:$0xff]  ;;  %310 = vmatpush.msra.mxu2 %v309_v5  ;;  %v308_v7 = vld [vmem:[%s635_s25 + $0x70] sm:$0xff]  ;;  %v219_v8 = vld [vmem:[%s210_s22] sm:$0xff]  ;;  %470 = vmatpush.msra.mxu3 %v309_v5 }
  0x14   : > { %247 = vmatpush.msra.mxu0 %v223_v1  ;;  %270 = vmatpush.msra.mxu1 %v224_v3  ;;  %v307_v9 = vld [vmem:[%s635_s25 + $0x68] sm:$0xff]  ;;  %v306_v13 = vld [vmem:[%s635_s25 + $0x60] sm:$0xff]  ;;  %v305_v14 = vld [vmem:[%s635_s25 + $0x58] sm:$0xff] }
  0x15   : > { %v220_v11 = vld [vmem:[%s210_s22 + $0x8] sm:$0xff]  ;;  %311 = vmatpush.msra.mxu2 %v308_v7  ;;  %471 = vmatpush.msra.mxu3 %v308_v7  ;;  %v304_v15 = vld [vmem:[%s635_s25 + $0x50] sm:$0xff]  ;;  %v302_v17 = vld [vmem:[%s635_s25 + $0x40] sm:$0xff] }
  0x16   : > { %248 = vmatpush.msra.mxu0 %v221_v4  ;;  %271 = vmatpush.msra.mxu1 %v222_v6  ;;  %v303_v16 = vld [vmem:[%s635_s25 + $0x48] sm:$0xff]  ;;  %v301_v18 = vld [vmem:[%s635_s25 + $0x38] sm:$0xff]  ;;  %v300_v19 = vld [vmem:[%s635_s25 + $0x30] sm:$0xff] }
  0x17   : > { %312 = vmatpush.msra.mxu2 %v307_v9  ;;  %472 = vmatpush.msra.mxu3 %v307_v9  ;;  %v299_v20 = vld [vmem:[%s635_s25 + $0x28] sm:$0xff]  ;;  %v298_v21 = vld [vmem:[%s635_s25 + $0x20] sm:$0xff]  ;;  %v297_v22 = vld [vmem:[%s635_s25 + $0x18] sm:$0xff] }
  0x18   : > { %249 = vmatpush.msra.mxu0 %v219_v8  ;;  %272 = vmatpush.msra.mxu1 %v220_v11  ;;  %v296_v23 = vld [vmem:[%s635_s25 + $0x10] sm:$0xff]  ;;  %v295_v24 = vld [vmem:[%s635_s25 + $0x8] sm:$0xff]  ;;  %v294_v25 = vld [vmem:[%s635_s25] sm:$0xff] }
  0x19   : > { %457 = vmatmul.msk.f32.vlgmr.msra.gmra.mxu0 %vm227_vm0, %v217_v10  ;;  %459 = vmatmul.msk.f32.vlgmr.msra.gmra.mxu1 %vm227_vm0, %v217_v10 }
  0x1a   : > { %313 = vmatpush.msra.mxu2 %v306_v13  ;;  %473 = vmatpush.msra.mxu3 %v306_v13 }
  0x1c   : > { %314 = vmatpush.msra.mxu2 %v305_v14  ;;  %474 = vmatpush.msra.mxu3 %v305_v14 }
  0x1e   : > { %315 = vmatpush.msra.mxu2 %v304_v15  ;;  %475 = vmatpush.msra.mxu3 %v304_v15 }
  0x20   : > { %316 = vmatpush.msra.mxu2 %v303_v16  ;;  %476 = vmatpush.msra.mxu3 %v303_v16 }
  0x21   : > { %458 = vmatmul.msk.f32.gmra.mxu0 %vm227_vm0, %v218_v12  ;;  %460 = vmatmul.msk.f32.gmra.mxu1 %vm227_vm0, %v218_v12 }
  0x22   : > { %317 = vmatpush.msra.mxu2 %v302_v17  ;;  %477 = vmatpush.msra.mxu3 %v302_v17 }
  0x24   : > { %318 = vmatpush.msra.mxu2 %v301_v18  ;;  %478 = vmatpush.msra.mxu3 %v301_v18 }
  0x26   : > { %319 = vmatpush.msra.mxu2 %v300_v19  ;;  %479 = vmatpush.msra.mxu3 %v300_v19 }
  0x28   : > { %320 = vmatpush.msra.mxu2 %v299_v20  ;;  %480 = vmatpush.msra.mxu3 %v299_v20 }
  0x2a   : > { %321 = vmatpush.msra.mxu2 %v298_v21  ;;  %481 = vmatpush.msra.mxu3 %v298_v21 }
  0x2c   : > { %322 = vmatpush.msra.mxu2 %v297_v22  ;;  %482 = vmatpush.msra.mxu3 %v297_v22 }
  0x2e   : > { %323 = vmatpush.msra.mxu2 %v296_v23  ;;  %483 = vmatpush.msra.mxu3 %v296_v23 }
  0x30   : > { %324 = vmatpush.msra.mxu2 %v295_v24  ;;  %484 = vmatpush.msra.mxu3 %v295_v24 }
  0x32   : > { %325 = vmatpush.msra.mxu2 %v294_v25  ;;  %485 = vmatpush.msra.mxu3 %v294_v25 }
  0x96   : > { %v251_v26 = vpop.f32.mrf.mxu0  ;;  %v274_v34 = vpop.f32.mrf.mxu1 }
  0x97   : > { %v280_v27 = vsub.f32 0.0, %v251_v26 }
  0x99   : > { %v282_v28 = vmul.f32 1.442695, %v280_v27 }
  0x9b   : > { %519 = vpow2.f32 %v282_v28 }
  0x9e   : > { %v254_v29 = vpop.f32.mrf.mxu0  ;;  %v277_v41 = vpop.f32.mrf.mxu1 }
  0x9f   : > { %v281_v30 = vsub.f32 0.0, %v254_v29 }
  0xa1   : > { %v520_v31 = vpop.eup %519  ;;  %v284_v32 = vmul.f32 1.442695, %v281_v30 }
  0xa2   : > { %v286_v33 = vadd.f32 1.0, %v520_v31 }
  0xa3   : > { %521 = vpow2.f32 %v284_v32 }
  0xa4   : > { %523 = vrcp.f32 %v286_v33 }
  0xa9   : > { %v522_v35 = vpop.eup %521 }
  0xaa   : > { %v524_v36 = vpop.eup %523  ;;  %v287_v37 = vadd.f32 1.0, %v522_v35 }
  0xab   : > { %v290_v38 = vmul.f32 %v524_v36, %v251_v26 }
  0xac   : > { %525 = vrcp.f32 %v287_v37 }
  0xad   : > { %v292_v39 = vmul.f32 %v290_v38, %v274_v34 }
  0xaf   : > { %326 = vmatmul.f32.vlgmr.msra.gmra.mxu2 %v292_v39 }
  0xb2   : > { %v526_v40 = vpop.eup %525 }
  0xb3   : > { %v291_v42 = vmul.f32 %v526_v40, %v254_v29 }
  0xb5   : > { %v293_v43 = vmul.f32 %v291_v42, %v277_v41 }
  0xb7   : > { %329 = vmatmul.f32.vlgmr.msra.gmra.mxu3 %v293_v43 }
 0x132   : > { %v327_v44 = vpop.f32.mrf.mxu2 }
 0x136   : > { %336 = sbr.rel (%p461_p5) target bundleno = 317 (0x13d), region = 36 }
 0x13a   : > { %v330_v45 = vpop.f32.mrf.mxu3 }
 0x13b   : > { %337 = vst.msk [vmem:[#allocation2] sm:$0xff] %vm227_vm0, %v327_v44 }
 0x13c   : > { %338 = vst.msk [vmem:[#allocation2 + $0x8] sm:$0xff] %vm227_vm0, %v330_v45 }
 0x13d PF: > { %p462_p6 = scmp.eq.s32.totalorder %s573_s12, 0 }
 0x13f   : > { %342 = sbr.rel (%p462_p6) target bundleno = 329 (0x149), region = 40 }
 0x144   : > { %v343_v46 = vld [vmem:[#allocation2] sm:$0xff]  ;;  %v344_v47 = vld [vmem:[#allocation2 + $0x8] sm:$0xff] }
 0x145   : > { %v345_v48 = vadd.f32 %v343_v46, %v327_v44  ;;  %v346_v49 = vadd.f32 %v344_v47, %v330_v45 }
 0x147   : > { %347 = vst.msk [vmem:[#allocation2] sm:$0xff] %vm227_vm0, %v345_v48 }
 0x148   : > { %348 = vst.msk [vmem:[#allocation2 + $0x8] sm:$0xff] %vm227_vm0, %v346_v49 }
 0x149 PF: > { %p463_p7 = scmp.ne.s32.totalorder %s573_s12, 1 }
 0x14b   : > { %352 = sbr.rel (%p463_p7) target bundleno = 339 (0x153), region = 44 }
 0x150   : > { %v353_v50 = vld [vmem:[#allocation2] sm:$0xff]  ;;  %v354_v51 = vld [vmem:[#allocation2 + $0x8] sm:$0xff] }
 0x151   : > { %355 = vst.msk [vmem:[#allocation3] sm:$0xff] %vm227_vm0, %v353_v50 }
 0x152   : > { %356 = vst.msk [vmem:[#allocation3 + $0x8] sm:$0xff] %vm227_vm0, %v354_v51 }
 0x153 PF: > { %p490_p8 = scmp.eq.s32.totalorder %s448_s15, 1  ;;  %s367_s5 = sshll.u32 %s689_s3, 4  ;;  %s368_s5 = int_to_ptr.hbm [resolvable:$true] %s367_s5 }
 0x154   : > { %s583_s6 = smov [#allocation3]   ;;  %s584_s8 = smov 128  }
 0x155   : > { %s365_s7 = sshll.u32 %s583_s6, 4  ;;  %s585_s9 = smov 8   ;;  %s366_s7 = int_to_ptr.vmem [resolvable:$true] %s365_s7 }
 0x156   : > { %487 = dma.vmem_to_hbm [thread:$0]  (%p490_p8), %s366_s7, 256, %s368_s5, [#allocation4], %s584_s8, %s584_s8, %s585_s9  }
 0x157   : > { %568 = dma.done.wait (%p490_p8), [#allocation4], 256  }
 0x158   : > { %570 = vsyncadd (%p490_p8), [#allocation4], 4294967040 }
 0x159 PF: > { %s14_s14 = sadd.s32 1, %s581_s14   ;;  %s690_s12 = smov %s577_s13 }
 0x15a   : > { %p11_p9 = scmp.ge.s32.totalorder %s14_s14, 4   ;;  %s691_s13 = smov %s693_s16 }
 0x15c   :  { %13 = sbr.rel (!%p11_p9) target bundleno = 2 (0x2), region = 78 }
 0x161   :  { %384 = vsyncpa [#allocation4], 1 }
 0x162   :  { %386 = vsyncpa [#allocation4 + $0x1], 1 }

</bundles_post_ra>
